<compile_context>
chip_gen: v6e
topology: v6e:2x2x1
jax: 0.10.0
libtpu: 0.0.40
codegen_flags: <defaults>
</compile_context>

<pallas_src>
import math
import functools

import jax
import jax.numpy as jnp
from jax import lax
from jax.experimental import pallas as pl
from jax.experimental.pallas import tpu as pltpu

NEG_BIG = -float(2 ** 31)  # matches torch's  -2**31 * ones_like(mask).float()


def _mhsa_kernel(
    lens_ref,                 # SMEM (B,) int32   valid-key count per batch row
    x_ref,                    # (TB*S, D) f32     flattened input rows
    wqkv_ref, bqkv_ref,       # (D, 3D) bf16, (1, 3D) f32   fused Q|K|V proj
    wo_ref, bo_ref,           # (D, D) bf16,  (1, D) f32    output dense
    gamma_ref, beta_ref,      # (1, D) f32                  LayerNorm affine
    o_ref,                    # (TB*S, D) output
    *, num_heads, seq_len, batch_block, eps):
    S = seq_len
    TB = batch_block
    rows, D = x_ref.shape                            # rows == TB * S
    H = num_heads
    dh = D // H

    x = x_ref[...]                                   # f32, kept for the residual
    xb = x.astype(jnp.bfloat16)

    # ---- fused Q|K|V projection: one wide MXU pass --------------------------
    # (1/sqrt(dh) is already folded into the Q columns of wqkv/bqkv.)
    qkv = jnp.dot(xb, wqkv_ref[...],
                  preferred_element_type=jnp.float32) + bqkv_ref[...]
    q = qkv[:, 0 * D:1 * D]
    k = qkv[:, 1 * D:2 * D]
    v = qkv[:, 2 * D:3 * D]

    # ---- key-validity row mask, (TB, 1, S), hoisted out of the head loop ----
    base = pl.program_id(0) * TB
    key_idx = lax.broadcasted_iota(jnp.int32, (TB, 1, S), 2)
    b_idx = lax.broadcasted_iota(jnp.int32, (TB, 1, S), 0)
    lens_b = jnp.zeros((TB, 1, S), jnp.int32)
    for b in range(TB):                              # TB small, fully unrolled
        lens_b = jnp.where(b_idx == b, lens_ref[base + b], lens_b)
    key_valid = key_idx < lens_b                     # (TB, 1, S) bool

    # ---- per-head attention (short unrolled loop; each iter is TB-batched) --
    ctx_parts = []
    for h in range(H):
        lo = h * dh
        q_h = q[:, lo:lo + dh].reshape(TB, S, dh).astype(jnp.bfloat16)
        k_h = k[:, lo:lo + dh].reshape(TB, S, dh).astype(jnp.bfloat16)
        v_h = v[:, lo:lo + dh].reshape(TB, S, dh).astype(jnp.bfloat16)

        scores = jnp.einsum('bqd,bkd->bqk', q_h, k_h,
                            preferred_element_type=jnp.float32)  # (TB,S,S) f32
        scores = jnp.where(key_valid, scores, NEG_BIG)

        # numerically-stable softmax; normalization deferred past the P.V matmul
        m = jnp.max(scores, axis=-1, keepdims=True)
        e = jnp.exp(scores - m)                                   # unnormalized
        denom = jnp.sum(e, axis=-1, keepdims=True)                # (TB,S,1), >= 1

        ctx_h = jnp.einsum('bqk,bkd->bqd', e.astype(jnp.bfloat16), v_h,
                           preferred_element_type=jnp.float32)    # (TB,S,dh)
        ctx_h = ctx_h * pl.reciprocal(denom, approx=True)         # dh-wide scale
        ctx_parts.append(ctx_h.reshape(rows, dh).astype(jnp.bfloat16))

    # one lane concatenate -> dense (rows, D) bf16 value, feeds the MXU directly
    ctx = jnp.concatenate(ctx_parts, axis=-1)

    # ---- output dense + residual + LayerNorm (TF style, eps inside sqrt) ----
    hidden = (jnp.dot(ctx, wo_ref[...], preferred_element_type=jnp.float32)
              + bo_ref[...] + x)

    u = jnp.mean(hidden, axis=-1, keepdims=True)
    centered = hidden - u
    var = jnp.mean(centered * centered, axis=-1, keepdims=True)
    normed = centered * lax.rsqrt(var + eps)
    o_ref[...] = (gamma_ref[...] * normed + beta_ref[...]).astype(o_ref.dtype)


def _pick_batch_block(B, S):
    """Largest TB <= 8 dividing B, with (TB*S) sublane-aligned and grid >= 2 if possible."""
    best = None
    for tb in range(min(B, 8), 0, -1):
        if B % tb:
            continue
        if tb != B and (tb * S) % 8:
            continue
        if best is None:
            best = tb
        if B // tb >= 2:          # prefer >= 2 grid steps for software pipelining
            return tb
    return best if best is not None else B


def self_attention_pallas(x, lens, params, *, num_heads, eps=1e-12,
                          batch_block=None):
    """x: (B, S, D) float32, lens: (B,) int (assumes lens.max() == S, lens >= 1)."""
    B, S, D = x.shape
    assert D % num_heads == 0, "hidden size must be a multiple of num_heads"

    TB = batch_block if batch_block is not None else _pick_batch_block(B, S)
    assert B % TB == 0, "batch_block must divide the batch size"
    assert TB == B or (TB * S) % 8 == 0, "sub-batch blocks need (TB*S) % 8 == 0"

    dh = D // num_heads
    inv_sqrt_dh = 1.0 / math.sqrt(dh)

    # Fuse the three projections; fold 1/sqrt(dh) into the Q columns while the
    # concat/cast is happening anyway; ship matmul weights in bf16.
    wqkv = jnp.concatenate(
        [params["wq"] * inv_sqrt_dh, params["wk"], params["wv"]],
        axis=1).astype(jnp.bfloat16)
    bqkv = jnp.concatenate(
        [params["bq"] * inv_sqrt_dh, params["bk"], params["bv"]],
        axis=1).astype(jnp.float32)
    wo = params["wo"].astype(jnp.bfloat16)
    bo = params["bo"].astype(jnp.float32)
    gamma = params["gamma"].astype(jnp.float32)
    beta = params["beta"].astype(jnp.float32)

    # TODO(synk): optionally ship x in bf16 (halves input DMA) once parity
    # requirements allow; residual + LayerNorm would then upcast in-kernel.
    x2 = x.reshape(B * S, D).astype(jnp.float32)
    lens1 = jnp.asarray(lens, jnp.int32).reshape(B)

    rows = TB * S
    kern = functools.partial(_mhsa_kernel, num_heads=num_heads, seq_len=S,
                             batch_block=TB, eps=eps)

    full = lambda shape: pl.BlockSpec(shape, lambda i, lens: (0, 0))

    H = num_heads
    flops = B * (8 * S * D * D + 4 * S * S * D)
    transcendentals = B * H * S * S + B * H * S + B * S
    bytes_accessed = (2 * B * S * D * 4            # x in + out (f32)
                      + (3 * D * D + D * D) * 2    # bf16 matmul weights
                      + 6 * D * 4 + B * 4)         # biases / gamma / beta / lens

    # Per-step VMEM estimate: double-buffered x/out blocks + bf16 weights +
    # live intermediates; keep the explicit scoped limit <= 64 MiB so the same
    # sizing is valid on v7x's per-TC VMEM.
    vmem_est = (
        4 * rows * D * 4                   # x block + out block, 2x buffered, f32
        + 2 * 4 * D * D * 2                # wqkv + wo bf16, 2x buffered
        + rows * 3 * D * (4 + 2)           # qkv f32 + bf16 head slices
        + 4 * TB * S * S * 4               # live (TB,S,S) score / exp tensors
        + 2 * rows * D * 2                 # bf16 context assembly
    )
    vmem_limit = int(min(max(int(1.5 * vmem_est) + (2 << 20), 16 << 20), 64 << 20))

    out2 = pl.pallas_call(
        kern,
        out_shape=jax.ShapeDtypeStruct((B * S, D), x.dtype),
        grid_spec=pltpu.PrefetchScalarGridSpec(
            num_scalar_prefetch=1,                       # lens -> SMEM
            grid=(B // TB,),
            in_specs=[
                pl.BlockSpec((rows, D), lambda i, lens: (i, 0)),   # x rows
                full((D, 3 * D)), full((1, 3 * D)),                # fused Wqkv, bqkv
                full((D, D)), full((1, D)),                        # Wo, bo
                full((1, D)), full((1, D)),                        # gamma, beta
            ],
            out_specs=pl.BlockSpec((rows, D), lambda i, lens: (i, 0)),
        ),
        compiler_params=pltpu.CompilerParams(
            dimension_semantics=("parallel",),
            vmem_limit_bytes=vmem_limit),
        cost_estimate=pl.CostEstimate(
            flops=flops, transcendentals=transcendentals,
            bytes_accessed=bytes_accessed),
    )(lens1, x2, wqkv, bqkv, wo, bo, gamma, beta)

    return out2.reshape(B, S, D)


def self_attention_reference(x, lens, params, *, num_heads, eps=1e-12):
    """Pure-JAX f32 reference mirroring the PyTorch forward (eval-mode dropout)."""
    B, S, D = x.shape
    dh = D // num_heads

    def lin(t, w, b):
        return t @ w + b[0]

    q = lin(x, params["wq"], params["bq"])
    k = lin(x, params["wk"], params["bk"])
    v = lin(x, params["wv"], params["bv"])

    def heads(t):  # (B,S,D) -> (B,H,S,dh)
        return t.reshape(B, S, num_heads, dh).transpose(0, 2, 1, 3)

    qh, kh, vh = heads(q), heads(k), heads(v)
    scores = jnp.einsum("bhqd,bhkd->bhqk", qh, kh) / math.sqrt(dh)
    mask = (jnp.arange(S)[None, :] < lens[:, None])[:, None, None, :]  # (B,1,1,S)
    scores = jnp.where(mask, scores, NEG_BIG)
    probs = jax.nn.softmax(scores, axis=-1)
    ctx = jnp.einsum("bhqk,bhkd->bhqd", probs, vh)
    ctx = ctx.transpose(0, 2, 1, 3).reshape(B, S, D)
    hidden = lin(ctx, params["wo"], params["bo"]) + x
    u = hidden.mean(-1, keepdims=True)
    s = ((hidden - u) ** 2).mean(-1, keepdims=True)
    normed = (hidden - u) / jnp.sqrt(s + eps)
    return params["gamma"][0] * normed + params["beta"][0]


if __name__ == "__main__":
    B, S = 2, 8
    num_heads = 4
    input_size = hidden_size = 32   # residual add requires input_size == hidden_size
    D = hidden_size

    key = jax.random.PRNGKey(0)
    ks = jax.random.split(key, 10)

    scale = 0.1
    params = {
        # Linear weights stored pre-transposed: (in, out)
        "wq": scale * jax.random.normal(ks[0], (input_size, D), jnp.float32),
        "bq": scale * jax.random.normal(ks[1], (1, D), jnp.float32),
        "wk": scale * jax.random.normal(ks[2], (input_size, D), jnp.float32),
        "bk": scale * jax.random.normal(ks[3], (1, D), jnp.float32),
        "wv": scale * jax.random.normal(ks[4], (input_size, D), jnp.float32),
        "bv": scale * jax.random.normal(ks[5], (1, D), jnp.float32),
        "wo": scale * jax.random.normal(ks[6], (D, D), jnp.float32),
        "bo": scale * jax.random.normal(ks[7], (1, D), jnp.float32),
        "gamma": jnp.ones((1, D), jnp.float32),
        "beta": jnp.zeros((1, D), jnp.float32),
    }

    x = jax.random.normal(ks[8], (B, S, D), jnp.float32)
    # lens: max must equal S (matches the PyTorch code's max_len broadcast); lens >= 1
    lens = jnp.array([S, S - 3], dtype=jnp.int32)

    out = self_attention_pallas(x, lens, params, num_heads=num_heads)
    out = jax.block_until_ready(out)

    ref = self_attention_reference(x, lens, params, num_heads=num_heads)
    assert out.shape == (B, S, D)
    # bf16 MXU inputs + approximate EUP reciprocal => looser tolerance vs f32 ref
    assert jnp.allclose(out, ref, atol=2e-2, rtol=2e-2), "mismatch vs JAX reference"

    print("KERNEL_OK")
</pallas_src>

<mosaic_0001>
module attributes {stable_mosaic.version = 11 : i64} {
  func.func @_mhsa_kernel(%arg0: i32, %arg1: memref<2xi32, #tpu.memory_space<smem>>, %arg2: memref<8x32xf32, #tpu.memory_space<vmem>>, %arg3: memref<32x96xbf16, #tpu.memory_space<vmem>>, %arg4: memref<1x96xf32, #tpu.memory_space<vmem>>, %arg5: memref<32x32xbf16, #tpu.memory_space<vmem>>, %arg6: memref<1x32xf32, #tpu.memory_space<vmem>>, %arg7: memref<1x32xf32, #tpu.memory_space<vmem>>, %arg8: memref<1x32xf32, #tpu.memory_space<vmem>>, %arg9: memref<8x32xf32, #tpu.memory_space<vmem>>) attributes {dimension_semantics = [#tpu.dimension_semantics<parallel>], iteration_bounds = array<i64: 2>, scalar_prefetch = 1 : i64, scratch_operands = 0 : i64, tpu.core_type = #tpu.core_type<tc>, window_params = [{transform_indices = @transform_0, window_bounds = array<i64: 8, 32>}, {pipeline_mode = #tpu.pipeline_mode<synchronous>, transform_indices = @transform_1, window_bounds = array<i64: 32, 96>}, {pipeline_mode = #tpu.pipeline_mode<synchronous>, transform_indices = @transform_2, window_bounds = array<i64: 1, 96>}, {pipeline_mode = #tpu.pipeline_mode<synchronous>, transform_indices = @transform_3, window_bounds = array<i64: 32, 32>}, {pipeline_mode = #tpu.pipeline_mode<synchronous>, transform_indices = @transform_4, window_bounds = array<i64: 1, 32>}, {pipeline_mode = #tpu.pipeline_mode<synchronous>, transform_indices = @transform_5, window_bounds = array<i64: 1, 32>}, {pipeline_mode = #tpu.pipeline_mode<synchronous>, transform_indices = @transform_6, window_bounds = array<i64: 1, 32>}, {transform_indices = @transform_7, window_bounds = array<i64: 8, 32>}]} {
    %c0 = arith.constant 0 : index
    %c0_0 = arith.constant 0 : index
    %0 = vector.load %arg2[%c0, %c0_0] : memref<8x32xf32, #tpu.memory_space<vmem>>, vector<8x32xf32>
    %1 = arith.truncf %0 : vector<8x32xf32> to vector<8x32xbf16>
    %c0_1 = arith.constant 0 : index
    %c0_2 = arith.constant 0 : index
    %2 = vector.load %arg3[%c0_1, %c0_2] : memref<32x96xbf16, #tpu.memory_space<vmem>>, vector<32x96xbf16>
    %cst = arith.constant dense<0.000000e+00> : vector<8x96xf32>
    %3 = tpu.matmul %1, %2, %cst {dimension_numbers = #tpu.dot_dimension_numbers<[1], [0], [0], [1], [0, 0, 1, 1], [], []>} : vector<8x32xbf16>, vector<32x96xbf16>, vector<8x96xf32> -> vector<8x96xf32>
    %c0_3 = arith.constant 0 : index
    %c0_4 = arith.constant 0 : index
    %4 = vector.load %arg4[%c0_3, %c0_4] : memref<1x96xf32, #tpu.memory_space<vmem>>, vector<1x96xf32>
    %5 = vector.broadcast %4 : vector<1x96xf32> to vector<8x96xf32>
    %6 = arith.addf %3, %5 : vector<8x96xf32>
    %7 = vector.extract_strided_slice %6 {offsets = [0, 0], sizes = [8, 32], strides = [1, 1]} : vector<8x96xf32> to vector<8x32xf32>
    %8 = vector.extract_strided_slice %6 {offsets = [0, 32], sizes = [8, 32], strides = [1, 1]} : vector<8x96xf32> to vector<8x32xf32>
    %9 = vector.extract_strided_slice %6 {offsets = [0, 64], sizes = [8, 32], strides = [1, 1]} : vector<8x96xf32> to vector<8x32xf32>
    %c1_i32 = arith.constant 1 : i32
    %10 = arith.muli %arg0, %c1_i32 : i32
    %11 = tpu.iota {dimensions = array<i32: 2>} : vector<1x1x8xi32>
    %12 = tpu.iota {dimensions = array<i32: 0>} : vector<1x1x8xi32>
    %c0_i32 = arith.constant 0 : i32
    %13 = vector.broadcast %c0_i32 : i32 to vector<1x1x8xi32>
    %c0_i32_5 = arith.constant 0 : i32
    %14 = vector.broadcast %c0_i32_5 : i32 to vector<1x1x8xi32>
    %15 = arith.cmpi eq, %12, %14 : vector<1x1x8xi32>
    %c0_i32_6 = arith.constant 0 : i32
    %16 = arith.addi %10, %c0_i32_6 : i32
    %17 = arith.index_cast %16 : i32 to index
    %18 = memref.load %arg1[%17] : memref<2xi32, #tpu.memory_space<smem>>
    %19 = vector.broadcast %18 : i32 to vector<1x1x8xi32>
    %20 = arith.select %15, %19, %13 : vector<1x1x8xi1>, vector<1x1x8xi32>
    %21 = arith.cmpi slt, %11, %20 : vector<1x1x8xi32>
    %22 = vector.extract_strided_slice %7 {offsets = [0, 0], sizes = [8, 8], strides = [1, 1]} : vector<8x32xf32> to vector<8x8xf32>
    %23 = vector.shape_cast %22 : vector<8x8xf32> to vector<1x8x8xf32>
    %24 = arith.truncf %23 : vector<1x8x8xf32> to vector<1x8x8xbf16>
    %25 = vector.extract_strided_slice %8 {offsets = [0, 0], sizes = [8, 8], strides = [1, 1]} : vector<8x32xf32> to vector<8x8xf32>
    %26 = vector.shape_cast %25 : vector<8x8xf32> to vector<1x8x8xf32>
    %27 = arith.truncf %26 : vector<1x8x8xf32> to vector<1x8x8xbf16>
    %28 = vector.extract_strided_slice %9 {offsets = [0, 0], sizes = [8, 8], strides = [1, 1]} : vector<8x32xf32> to vector<8x8xf32>
    %29 = vector.shape_cast %28 : vector<8x8xf32> to vector<1x8x8xf32>
    %30 = arith.truncf %29 : vector<1x8x8xf32> to vector<1x8x8xbf16>
    "tpu.trace_start"() <{level = 10 : i32, message = "bqd,bkd->bqk"}> : () -> ()
    %cst_7 = arith.constant dense<0.000000e+00> : vector<1x8x8xf32>
    %31 = tpu.matmul %24, %27, %cst_7 {dimension_numbers = #tpu.dot_dimension_numbers<[2], [2], [1], [1], [0, 0, 0, 1, 1, 1], [0], [0]>} : vector<1x8x8xbf16>, vector<1x8x8xbf16>, vector<1x8x8xf32> -> vector<1x8x8xf32>
    %cst_8 = arith.constant -2.14748365E+9 : f32
    "tpu.trace_stop"() : () -> ()
    %32 = vector.shape_cast %21 : vector<1x1x8xi1> to vector<1x1x8xi1>
    %33 = vector.broadcast %32 : vector<1x1x8xi1> to vector<1x8x8xi1>
    %34 = vector.broadcast %cst_8 : f32 to vector<1x8x8xf32>
    %35 = arith.select %33, %31, %34 : vector<1x8x8xi1>, vector<1x8x8xf32>
    %cst_9 = arith.constant dense<0xFF800000> : vector<1x8xf32>
    %36 = vector.multi_reduction <maximumf>, %35, %cst_9 [2] : vector<1x8x8xf32> to vector<1x8xf32>
    %37 = vector.shape_cast %36 : vector<1x8xf32> to vector<1x8x1xf32>
    %38 = vector.broadcast %37 : vector<1x8x1xf32> to vector<1x8x8xf32>
    %39 = arith.subf %35, %38 : vector<1x8x8xf32>
    %40 = math.exp %39 : vector<1x8x8xf32>
    %cst_10 = arith.constant dense<0.000000e+00> : vector<1x8xf32>
    %41 = vector.multi_reduction <add>, %40, %cst_10 [2] : vector<1x8x8xf32> to vector<1x8xf32>
    %42 = vector.shape_cast %41 : vector<1x8xf32> to vector<1x8x1xf32>
    %43 = arith.truncf %40 : vector<1x8x8xf32> to vector<1x8x8xbf16>
    "tpu.trace_start"() <{level = 10 : i32, message = "bqk,bkd->bqd"}> : () -> ()
    %cst_11 = arith.constant dense<0.000000e+00> : vector<1x8x8xf32>
    %44 = tpu.matmul %43, %30, %cst_11 {dimension_numbers = #tpu.dot_dimension_numbers<[2], [1], [1], [2], [0, 0, 0, 1, 1, 2], [0], [0]>} : vector<1x8x8xbf16>, vector<1x8x8xbf16>, vector<1x8x8xf32> -> vector<1x8x8xf32>
    "tpu.trace_stop"() : () -> ()
    %45 = tpu.reciprocal %42 {approx = true} : vector<1x8x1xf32> -> vector<1x8x1xf32>
    %46 = vector.broadcast %45 : vector<1x8x1xf32> to vector<1x8x8xf32>
    %47 = arith.mulf %44, %46 : vector<1x8x8xf32>
    %48 = vector.shape_cast %47 : vector<1x8x8xf32> to vector<8x8xf32>
    %49 = arith.truncf %48 : vector<8x8xf32> to vector<8x8xbf16>
    %50 = vector.extract_strided_slice %7 {offsets = [0, 8], sizes = [8, 8], strides = [1, 1]} : vector<8x32xf32> to vector<8x8xf32>
    %51 = vector.shape_cast %50 : vector<8x8xf32> to vector<1x8x8xf32>
    %52 = arith.truncf %51 : vector<1x8x8xf32> to vector<1x8x8xbf16>
    %53 = vector.extract_strided_slice %8 {offsets = [0, 8], sizes = [8, 8], strides = [1, 1]} : vector<8x32xf32> to vector<8x8xf32>
    %54 = vector.shape_cast %53 : vector<8x8xf32> to vector<1x8x8xf32>
    %55 = arith.truncf %54 : vector<1x8x8xf32> to vector<1x8x8xbf16>
    %56 = vector.extract_strided_slice %9 {offsets = [0, 8], sizes = [8, 8], strides = [1, 1]} : vector<8x32xf32> to vector<8x8xf32>
    %57 = vector.shape_cast %56 : vector<8x8xf32> to vector<1x8x8xf32>
    %58 = arith.truncf %57 : vector<1x8x8xf32> to vector<1x8x8xbf16>
    "tpu.trace_start"() <{level = 10 : i32, message = "bqd,bkd->bqk"}> : () -> ()
    %cst_12 = arith.constant dense<0.000000e+00> : vector<1x8x8xf32>
    %59 = tpu.matmul %52, %55, %cst_12 {dimension_numbers = #tpu.dot_dimension_numbers<[2], [2], [1], [1], [0, 0, 0, 1, 1, 1], [0], [0]>} : vector<1x8x8xbf16>, vector<1x8x8xbf16>, vector<1x8x8xf32> -> vector<1x8x8xf32>
    %cst_13 = arith.constant -2.14748365E+9 : f32
    "tpu.trace_stop"() : () -> ()
    %60 = vector.shape_cast %21 : vector<1x1x8xi1> to vector<1x1x8xi1>
    %61 = vector.broadcast %60 : vector<1x1x8xi1> to vector<1x8x8xi1>
    %62 = vector.broadcast %cst_13 : f32 to vector<1x8x8xf32>
    %63 = arith.select %61, %59, %62 : vector<1x8x8xi1>, vector<1x8x8xf32>
    %cst_14 = arith.constant dense<0xFF800000> : vector<1x8xf32>
    %64 = vector.multi_reduction <maximumf>, %63, %cst_14 [2] : vector<1x8x8xf32> to vector<1x8xf32>
    %65 = vector.shape_cast %64 : vector<1x8xf32> to vector<1x8x1xf32>
    %66 = vector.broadcast %65 : vector<1x8x1xf32> to vector<1x8x8xf32>
    %67 = arith.subf %63, %66 : vector<1x8x8xf32>
    %68 = math.exp %67 : vector<1x8x8xf32>
    %cst_15 = arith.constant dense<0.000000e+00> : vector<1x8xf32>
    %69 = vector.multi_reduction <add>, %68, %cst_15 [2] : vector<1x8x8xf32> to vector<1x8xf32>
    %70 = vector.shape_cast %69 : vector<1x8xf32> to vector<1x8x1xf32>
    %71 = arith.truncf %68 : vector<1x8x8xf32> to vector<1x8x8xbf16>
    "tpu.trace_start"() <{level = 10 : i32, message = "bqk,bkd->bqd"}> : () -> ()
    %cst_16 = arith.constant dense<0.000000e+00> : vector<1x8x8xf32>
    %72 = tpu.matmul %71, %58, %cst_16 {dimension_numbers = #tpu.dot_dimension_numbers<[2], [1], [1], [2], [0, 0, 0, 1, 1, 2], [0], [0]>} : vector<1x8x8xbf16>, vector<1x8x8xbf16>, vector<1x8x8xf32> -> vector<1x8x8xf32>
    "tpu.trace_stop"() : () -> ()
    %73 = tpu.reciprocal %70 {approx = true} : vector<1x8x1xf32> -> vector<1x8x1xf32>
    %74 = vector.broadcast %73 : vector<1x8x1xf32> to vector<1x8x8xf32>
    %75 = arith.mulf %72, %74 : vector<1x8x8xf32>
    %76 = vector.shape_cast %75 : vector<1x8x8xf32> to vector<8x8xf32>
    %77 = arith.truncf %76 : vector<8x8xf32> to vector<8x8xbf16>
    %78 = vector.extract_strided_slice %7 {offsets = [0, 16], sizes = [8, 8], strides = [1, 1]} : vector<8x32xf32> to vector<8x8xf32>
    %79 = vector.shape_cast %78 : vector<8x8xf32> to vector<1x8x8xf32>
    %80 = arith.truncf %79 : vector<1x8x8xf32> to vector<1x8x8xbf16>
    %81 = vector.extract_strided_slice %8 {offsets = [0, 16], sizes = [8, 8], strides = [1, 1]} : vector<8x32xf32> to vector<8x8xf32>
    %82 = vector.shape_cast %81 : vector<8x8xf32> to vector<1x8x8xf32>
    %83 = arith.truncf %82 : vector<1x8x8xf32> to vector<1x8x8xbf16>
    %84 = vector.extract_strided_slice %9 {offsets = [0, 16], sizes = [8, 8], strides = [1, 1]} : vector<8x32xf32> to vector<8x8xf32>
    %85 = vector.shape_cast %84 : vector<8x8xf32> to vector<1x8x8xf32>
    %86 = arith.truncf %85 : vector<1x8x8xf32> to vector<1x8x8xbf16>
    "tpu.trace_start"() <{level = 10 : i32, message = "bqd,bkd->bqk"}> : () -> ()
    %cst_17 = arith.constant dense<0.000000e+00> : vector<1x8x8xf32>
    %87 = tpu.matmul %80, %83, %cst_17 {dimension_numbers = #tpu.dot_dimension_numbers<[2], [2], [1], [1], [0, 0, 0, 1, 1, 1], [0], [0]>} : vector<1x8x8xbf16>, vector<1x8x8xbf16>, vector<1x8x8xf32> -> vector<1x8x8xf32>
    %cst_18 = arith.constant -2.14748365E+9 : f32
    "tpu.trace_stop"() : () -> ()
    %88 = vector.shape_cast %21 : vector<1x1x8xi1> to vector<1x1x8xi1>
    %89 = vector.broadcast %88 : vector<1x1x8xi1> to vector<1x8x8xi1>
    %90 = vector.broadcast %cst_18 : f32 to vector<1x8x8xf32>
    %91 = arith.select %89, %87, %90 : vector<1x8x8xi1>, vector<1x8x8xf32>
    %cst_19 = arith.constant dense<0xFF800000> : vector<1x8xf32>
    %92 = vector.multi_reduction <maximumf>, %91, %cst_19 [2] : vector<1x8x8xf32> to vector<1x8xf32>
    %93 = vector.shape_cast %92 : vector<1x8xf32> to vector<1x8x1xf32>
    %94 = vector.broadcast %93 : vector<1x8x1xf32> to vector<1x8x8xf32>
    %95 = arith.subf %91, %94 : vector<1x8x8xf32>
    %96 = math.exp %95 : vector<1x8x8xf32>
    %cst_20 = arith.constant dense<0.000000e+00> : vector<1x8xf32>
    %97 = vector.multi_reduction <add>, %96, %cst_20 [2] : vector<1x8x8xf32> to vector<1x8xf32>
    %98 = vector.shape_cast %97 : vector<1x8xf32> to vector<1x8x1xf32>
    %99 = arith.truncf %96 : vector<1x8x8xf32> to vector<1x8x8xbf16>
    "tpu.trace_start"() <{level = 10 : i32, message = "bqk,bkd->bqd"}> : () -> ()
    %cst_21 = arith.constant dense<0.000000e+00> : vector<1x8x8xf32>
    %100 = tpu.matmul %99, %86, %cst_21 {dimension_numbers = #tpu.dot_dimension_numbers<[2], [1], [1], [2], [0, 0, 0, 1, 1, 2], [0], [0]>} : vector<1x8x8xbf16>, vector<1x8x8xbf16>, vector<1x8x8xf32> -> vector<1x8x8xf32>
    "tpu.trace_stop"() : () -> ()
    %101 = tpu.reciprocal %98 {approx = true} : vector<1x8x1xf32> -> vector<1x8x1xf32>
    %102 = vector.broadcast %101 : vector<1x8x1xf32> to vector<1x8x8xf32>
    %103 = arith.mulf %100, %102 : vector<1x8x8xf32>
    %104 = vector.shape_cast %103 : vector<1x8x8xf32> to vector<8x8xf32>
    %105 = arith.truncf %104 : vector<8x8xf32> to vector<8x8xbf16>
    %106 = vector.extract_strided_slice %7 {offsets = [0, 24], sizes = [8, 8], strides = [1, 1]} : vector<8x32xf32> to vector<8x8xf32>
    %107 = vector.shape_cast %106 : vector<8x8xf32> to vector<1x8x8xf32>
    %108 = arith.truncf %107 : vector<1x8x8xf32> to vector<1x8x8xbf16>
    %109 = vector.extract_strided_slice %8 {offsets = [0, 24], sizes = [8, 8], strides = [1, 1]} : vector<8x32xf32> to vector<8x8xf32>
    %110 = vector.shape_cast %109 : vector<8x8xf32> to vector<1x8x8xf32>
    %111 = arith.truncf %110 : vector<1x8x8xf32> to vector<1x8x8xbf16>
    %112 = vector.extract_strided_slice %9 {offsets = [0, 24], sizes = [8, 8], strides = [1, 1]} : vector<8x32xf32> to vector<8x8xf32>
    %113 = vector.shape_cast %112 : vector<8x8xf32> to vector<1x8x8xf32>
    %114 = arith.truncf %113 : vector<1x8x8xf32> to vector<1x8x8xbf16>
    "tpu.trace_start"() <{level = 10 : i32, message = "bqd,bkd->bqk"}> : () -> ()
    %cst_22 = arith.constant dense<0.000000e+00> : vector<1x8x8xf32>
    %115 = tpu.matmul %108, %111, %cst_22 {dimension_numbers = #tpu.dot_dimension_numbers<[2], [2], [1], [1], [0, 0, 0, 1, 1, 1], [0], [0]>} : vector<1x8x8xbf16>, vector<1x8x8xbf16>, vector<1x8x8xf32> -> vector<1x8x8xf32>
    %cst_23 = arith.constant -2.14748365E+9 : f32
    "tpu.trace_stop"() : () -> ()
    %116 = vector.shape_cast %21 : vector<1x1x8xi1> to vector<1x1x8xi1>
    %117 = vector.broadcast %116 : vector<1x1x8xi1> to vector<1x8x8xi1>
    %118 = vector.broadcast %cst_23 : f32 to vector<1x8x8xf32>
    %119 = arith.select %117, %115, %118 : vector<1x8x8xi1>, vector<1x8x8xf32>
    %cst_24 = arith.constant dense<0xFF800000> : vector<1x8xf32>
    %120 = vector.multi_reduction <maximumf>, %119, %cst_24 [2] : vector<1x8x8xf32> to vector<1x8xf32>
    %121 = vector.shape_cast %120 : vector<1x8xf32> to vector<1x8x1xf32>
    %122 = vector.broadcast %121 : vector<1x8x1xf32> to vector<1x8x8xf32>
    %123 = arith.subf %119, %122 : vector<1x8x8xf32>
    %124 = math.exp %123 : vector<1x8x8xf32>
    %cst_25 = arith.constant dense<0.000000e+00> : vector<1x8xf32>
    %125 = vector.multi_reduction <add>, %124, %cst_25 [2] : vector<1x8x8xf32> to vector<1x8xf32>
    %126 = vector.shape_cast %125 : vector<1x8xf32> to vector<1x8x1xf32>
    %127 = arith.truncf %124 : vector<1x8x8xf32> to vector<1x8x8xbf16>
    "tpu.trace_start"() <{level = 10 : i32, message = "bqk,bkd->bqd"}> : () -> ()
    %cst_26 = arith.constant dense<0.000000e+00> : vector<1x8x8xf32>
    %128 = tpu.matmul %127, %114, %cst_26 {dimension_numbers = #tpu.dot_dimension_numbers<[2], [1], [1], [2], [0, 0, 0, 1, 1, 2], [0], [0]>} : vector<1x8x8xbf16>, vector<1x8x8xbf16>, vector<1x8x8xf32> -> vector<1x8x8xf32>
    "tpu.trace_stop"() : () -> ()
    %129 = tpu.reciprocal %126 {approx = true} : vector<1x8x1xf32> -> vector<1x8x1xf32>
    %130 = vector.broadcast %129 : vector<1x8x1xf32> to vector<1x8x8xf32>
    %131 = arith.mulf %128, %130 : vector<1x8x8xf32>
    %132 = vector.shape_cast %131 : vector<1x8x8xf32> to vector<8x8xf32>
    %133 = arith.truncf %132 : vector<8x8xf32> to vector<8x8xbf16>
    %134 = tpu.concatenate %49, %77, %105, %133 in 1 : vector<8x8xbf16>, vector<8x8xbf16>, vector<8x8xbf16>, vector<8x8xbf16> -> vector<8x32xbf16>
    %c0_27 = arith.constant 0 : index
    %c0_28 = arith.constant 0 : index
    %135 = vector.load %arg5[%c0_27, %c0_28] : memref<32x32xbf16, #tpu.memory_space<vmem>>, vector<32x32xbf16>
    %cst_29 = arith.constant dense<0.000000e+00> : vector<8x32xf32>
    %136 = tpu.matmul %134, %135, %cst_29 {dimension_numbers = #tpu.dot_dimension_numbers<[1], [0], [0], [1], [0, 0, 1, 1], [], []>} : vector<8x32xbf16>, vector<32x32xbf16>, vector<8x32xf32> -> vector<8x32xf32>
    %c0_30 = arith.constant 0 : index
    %c0_31 = arith.constant 0 : index
    %137 = vector.load %arg6[%c0_30, %c0_31] : memref<1x32xf32, #tpu.memory_space<vmem>>, vector<1x32xf32>
    %138 = vector.broadcast %137 : vector<1x32xf32> to vector<8x32xf32>
    %139 = arith.addf %136, %138 : vector<8x32xf32>
    %140 = arith.addf %139, %0 : vector<8x32xf32>
    %cst_32 = arith.constant dense<0.000000e+00> : vector<8xf32>
    %141 = vector.multi_reduction <add>, %140, %cst_32 [1] : vector<8x32xf32> to vector<8xf32>
    %142 = vector.shape_cast %141 : vector<8xf32> to vector<8x1xf32>
    %cst_33 = arith.constant 3.200000e+01 : f32
    %143 = vector.broadcast %cst_33 : f32 to vector<8x1xf32>
    %144 = arith.divf %142, %143 : vector<8x1xf32>
    %145 = vector.broadcast %144 : vector<8x1xf32> to vector<8x32xf32>
    %146 = arith.subf %140, %145 : vector<8x32xf32>
    %147 = arith.mulf %146, %146 : vector<8x32xf32>
    %cst_34 = arith.constant dense<0.000000e+00> : vector<8xf32>
    %148 = vector.multi_reduction <add>, %147, %cst_34 [1] : vector<8x32xf32> to vector<8xf32>
    %149 = vector.shape_cast %148 : vector<8xf32> to vector<8x1xf32>
    %cst_35 = arith.constant 3.200000e+01 : f32
    %150 = vector.broadcast %cst_35 : f32 to vector<8x1xf32>
    %151 = arith.divf %149, %150 : vector<8x1xf32>
    %cst_36 = arith.constant 9.99999996E-13 : f32
    %152 = vector.broadcast %cst_36 : f32 to vector<8x1xf32>
    %153 = arith.addf %151, %152 : vector<8x1xf32>
    %154 = math.rsqrt %153 : vector<8x1xf32>
    %155 = vector.broadcast %154 : vector<8x1xf32> to vector<8x32xf32>
    %156 = arith.mulf %146, %155 : vector<8x32xf32>
    %c0_37 = arith.constant 0 : index
    %c0_38 = arith.constant 0 : index
    %157 = vector.load %arg7[%c0_37, %c0_38] : memref<1x32xf32, #tpu.memory_space<vmem>>, vector<1x32xf32>
    %158 = vector.broadcast %157 : vector<1x32xf32> to vector<8x32xf32>
    %159 = arith.mulf %158, %156 : vector<8x32xf32>
    %c0_39 = arith.constant 0 : index
    %c0_40 = arith.constant 0 : index
    %160 = vector.load %arg8[%c0_39, %c0_40] : memref<1x32xf32, #tpu.memory_space<vmem>>, vector<1x32xf32>
    %161 = vector.broadcast %160 : vector<1x32xf32> to vector<8x32xf32>
    %162 = arith.addf %159, %161 : vector<8x32xf32>
    %c0_41 = arith.constant 0 : index
    %c0_42 = arith.constant 0 : index
    %163 = vector.load %arg9[%c0_41, %c0_42] : memref<8x32xf32, #tpu.memory_space<vmem>>, vector<8x32xf32>
    tpu.vector_store %arg9[%c0_41, %c0_42], %162 {strides = array<i32>} : memref<8x32xf32, #tpu.memory_space<vmem>>, vector<8x32xf32>,
    return
  }
  func.func @transform_0(%arg0: i32, %arg1: memref<2xi32, #tpu.memory_space<smem>>) -> (i32, i32) {
    %c0_i32 = arith.constant 0 : i32
    %c0_i32_0 = arith.constant 0 : i32
    return %arg0, %c0_i32 : i32, i32
  }
  func.func @transform_1(%arg0: i32, %arg1: memref<2xi32, #tpu.memory_space<smem>>) -> (i32, i32) {
    %c0_i32 = arith.constant 0 : i32
    %c0_i32_0 = arith.constant 0 : i32
    %c0_i32_1 = arith.constant 0 : i32
    return %c0_i32, %c0_i32_0 : i32, i32
  }
  func.func @transform_2(%arg0: i32, %arg1: memref<2xi32, #tpu.memory_space<smem>>) -> (i32, i32) {
    %c0_i32 = arith.constant 0 : i32
    %c0_i32_0 = arith.constant 0 : i32
    %c0_i32_1 = arith.constant 0 : i32
    return %c0_i32, %c0_i32_0 : i32, i32
  }
  func.func @transform_3(%arg0: i32, %arg1: memref<2xi32, #tpu.memory_space<smem>>) -> (i32, i32) {
    %c0_i32 = arith.constant 0 : i32
    %c0_i32_0 = arith.constant 0 : i32
    %c0_i32_1 = arith.constant 0 : i32
    return %c0_i32, %c0_i32_0 : i32, i32
  }
  func.func @transform_4(%arg0: i32, %arg1: memref<2xi32, #tpu.memory_space<smem>>) -> (i32, i32) {
    %c0_i32 = arith.constant 0 : i32
    %c0_i32_0 = arith.constant 0 : i32
    %c0_i32_1 = arith.constant 0 : i32
    return %c0_i32, %c0_i32_0 : i32, i32
  }
  func.func @transform_5(%arg0: i32, %arg1: memref<2xi32, #tpu.memory_space<smem>>) -> (i32, i32) {
    %c0_i32 = arith.constant 0 : i32
    %c0_i32_0 = arith.constant 0 : i32
    %c0_i32_1 = arith.constant 0 : i32
    return %c0_i32, %c0_i32_0 : i32, i32
  }
  func.func @transform_6(%arg0: i32, %arg1: memref<2xi32, #tpu.memory_space<smem>>) -> (i32, i32) {
    %c0_i32 = arith.constant 0 : i32
    %c0_i32_0 = arith.constant 0 : i32
    %c0_i32_1 = arith.constant 0 : i32
    return %c0_i32, %c0_i32_0 : i32, i32
  }
  func.func @transform_7(%arg0: i32, %arg1: memref<2xi32, #tpu.memory_space<smem>>) -> (i32, i32) {
    %c0_i32 = arith.constant 0 : i32
    %c0_i32_0 = arith.constant 0 : i32
    return %arg0, %c0_i32 : i32, i32
  }
}

</mosaic_0001>

<bundles_post_ra>
// kernel: tpu_custom_call.1
= control target key start
LH: loop header
LB: loop body
LE: loop exit
PB: predicated region body
PF: predicated region fallthrough
CT: control target
= control target key end

     0   :  { %s1461_s27 = smov [#allocation3]   ;;  %s1807_s0 = inlined_call_operand.hbm [shape: s32[2], index: 0, kind: input, shape index: {}]   ;;  %s1808_s1 = inlined_call_operand.hbm [shape: f32[16,32], index: 1, kind: input, shape index: {}]   ;;  %s1809_s2 = inlined_call_operand.hbm [shape: bf16[32,96], index: 2, kind: input, shape index: {}]   ;;  %s1810_s3 = inlined_call_operand.vmem [shape: f32[1,96], index: 3, kind: input, shape index: {}]   ;;  %s1811_s4 = inlined_call_operand.hbm [shape: bf16[32,32], index: 4, kind: input, shape index: {}]   ;;  %s1812_s5 = inlined_call_operand.vmem [shape: f32[1,32], index: 5, kind: input, shape index: {}]   ;;  %s1813_s6 = inlined_call_operand.vmem [shape: f32[1,32], index: 6, kind: input, shape index: {}]   ;;  %s1814_s7 = inlined_call_operand.vmem [shape: f32[1,32], index: 7, kind: input, shape index: {}]   ;;  %s1815_s8 = inlined_call_operand.hbm [shape: f32[16,32], index: 8, kind: output, shape index: {}]  }
   0x1   :  { %1820 = sst [smem:[#allocation15_spill]] %s1809_s2 }
   0x2   :  { %1821 = sst [smem:[#allocation16_spill]] %s1811_s4 }
   0x3   :  { %14 = dma.hbm_to_smem %s1807_s0, 16, %s1461_s27, [#allocation2] }
   0x4   :  { %1431 = dma.done.wait [#allocation2], 16 }
   0x5   :  { %1432 = vsyncadd [#allocation2], 4294967280 }
   0x6   :  { %16 = sfence }
   0x7   :  { %17 = vsyncpa [#allocation5], 0 }
   0x8   :  { %19 = vsyncpa [#allocation5 + $0x1], 0 }
   0x9   :  { %20 = vsyncpa [#allocation8], 0 }
   0xa   :  { %21 = vsyncpa [#allocation6], 0 }
   0xb   :  { %23 = vsyncpa [#allocation6 + $0x1], 0  ;;  %s1532_s30 = smov 0   ;;  %s1534_s9 = smov 0  }
   0xc   :  { %s1536_s10 = smov 0   ;;  %s1538_s11 = smov 0  }
   0xd LB: > { %s1553_s0 = sadd.s32 4294967295, %s1459_s11   ;;  %s1073_s12 = sadd.s32 4294967294, %s1459_s11   ;;  %s1459_s11 = sphi %s1538_s11, %s1843_s11   ;;  %s1455_s10 = sphi %s1536_s10, %s1842_s10   ;;  %s1451_s9 = sphi %s1534_s9, %s1841_s9   ;;  %s1447_s30 = sphi %s1532_s30, %s1840_s30  }
   0xe   : > { %p49_p0 = scmp.ne.s32.totalorder %s1451_s9, %s1447_s30  ;;  %p1816_p1 = scmp.eq.s32.totalorder %s1553_s0, 0 }
   0xf   : > { %p205_p3 = scmp.eq.s32.totalorder %s1073_s12, 1  ;;  %p1074_p5 = scmp.ge.s32.totalorder %s1459_s11, 1 }
  0x10   : > { %p1562_p4 = por %p1816_p1, %p49_p0  ;;  %p212_p7 = scmp.lt.s32.totalorder %s1459_s11, 3 }
  0x11   : > { %p1567_p6 = por %p205_p3, %p49_p0  ;;  %s1462_s16 = smov [#allocation7]  }
  0x12   : > { %s1822_s13 = scalar_select %p1562_p4, 1, 0 }
  0x13   : > { %s1823_s14 = scalar_select %p1567_p6, 1, 0 }
  0x14   : > { %p1572_p8 = pnand %p1074_p5, %p212_p7  ;;  %s224_s17 = sshll.u32 %s1462_s16, 4  ;;  %s225_s17 = int_to_ptr.vmem [resolvable:$true] %s224_s17 }
  0x15   : > { %s1463_s19 = smov [#allocation9]   ;;  %s1320_s21 = scalar_lea.vmem %s225_s17, 256 }
  0x16   : > { %s1824_s15 = scalar_select %p1572_p8, 1, 0 }
  0x17   : > { %p1205_p9 = pneg %p1572_p8  ;;  %s240_s20 = sshll.u32 %s1463_s19, 4  ;;  %s241_s20 = int_to_ptr.vmem [resolvable:$true] %s240_s20 }
  0x18   : > { %p1321_p13 = scmp.ne.s32.totalorder %s225_s17, %s1320_s21  ;;  %p1328_p5 = scmp.lt.s32.totalorder %s225_s17, %s225_s17 }
  0x19   : > { %p1581_p11 = pnand %p1205_p9, %p1816_p1  ;;  %p1329_p7 = scmp.lt.s32.totalorder %s1320_s21, %s1320_s21 }
  0x1b   : > { %p1311_p12 = pneg %p1581_p11  ;;  %p1330_p10 = por %p1329_p7, %p1328_p5 }
  0x1d   : > { %p1323_p0 = pnand %p1321_p13, %p1311_p12 }
  0x1f   : > { %p1324_p3 = pneg %p1323_p0 }
  0x21   : > { %p1331_p9 = pnand %p1330_p10, %p1324_p3 }
  0x23   : > { %1334 = shalt.err (!%p1331_p9)
}
  0x24   : > { %s1464_s22 = smov 64   ;;  %s1465_s23 = smov 4  }
  0x25   : > { %s1826_s2 = sld [smem:[#allocation15_spill]]  ;;  %s1346_s26 = scalar_lea.vmem %s241_s20, 256 }
  0x26   : > { %p1347_p1 = scmp.ne.s32.totalorder %s241_s20, %s1346_s26  ;;  %p1354_p2 = scmp.lt.s32.totalorder %s241_s20, %s241_s20 }
  0x27   : > { %p1355_p6 = scmp.lt.s32.totalorder %s1346_s26, %s1346_s26 }
  0x28   : > { %p1349_p13 = pnand %p1347_p1, %p1311_p12 }
  0x29   : > { %p1356_p5 = por %p1355_p6, %p1354_p2 }
  0x2a   : > { %p1350_p0 = pneg %p1349_p13 }
  0x2b   : > { %1208 = dma.hbm_to_vmem [thread:$0]  (!%p1581_p11), %s1826_s2, 256, %s225_s17, [#allocation8], %s1464_s22, %s1464_s22, %s1465_s23  }
  0x2c   : > { %p1357_p10 = pnand %p1356_p5, %p1350_p0 }
  0x2e   : > { %1360 = shalt.err (!%p1357_p10)
}
  0x2f   : > { %s1827_s4 = sld [smem:[#allocation16_spill]]  ;;  %s1604_s29 = sadd.s32 1, %s1459_s11  }
  0x30   : > { %s36_s12 = sadd.s32 1, %s1455_s10  ;;  %s33_s16 = ssub.s32 %s1459_s11, %s1604_s29 }
  0x31   : > { %p43_p1 = scmp.ne.s32.totalorder %s1455_s10, %s1451_s9  ;;  %p34_p2 = scmp.eq.s32.totalorder %s33_s16, 0 }
  0x32   : > { %p44_p6 = scmp.eq.s32.totalorder %s1459_s11, 0  ;;  %p1828_p12 = scmp.eq.s32.totalorder %s1553_s0, 1 }
  0x33   : > { %p1222_p7 = scmp.lt.s32.totalorder %s1459_s11, 2  ;;  %s263_s19 = sand.u32 1, %s1455_s10  }
  0x34   : > { %p1614_p3 = por %p1828_p12, %p43_p1  ;;  %p45_p9 = por %p44_p6, %p43_p1 }
  0x35   : > { %1211 = dma.hbm_to_vmem [thread:$0]  (!%p1581_p11), %s1827_s4, 256, %s241_s20, [#allocation8], %s1464_s22, %s1464_s22, %s1465_s23  }
  0x36   : > { %s1829_s17 = scalar_select %p1614_p3, 1, 0 }
  0x37   : > { %s1620_s18 = scalar_select %p34_p2, %s1455_s10, %s36_s12  }
  0x38   : > { %s1078_s21 = sshll.u32 %s263_s19, 3  ;;  %s1079_s20 = sshll.u32 %s1459_s11, 7 }
  0x39   : > { %s1627_s24 = scalar_lea.hbm %s1808_s1, %s1079_s20  ;;  %s267_s25 = scalar_lea.vmem [#allocation4], %s1078_s21 }
  0x3a   : > { %s274_s26 = sshll.u32 %s267_s25, 4  ;;  %p1629_p11 = pnand %p1222_p7, %p45_p9  ;;  %s275_s26 = int_to_ptr.vmem [resolvable:$true] %s274_s26 }
  0x3b   : > { %s264_s28 = scalar_lea.sflag [#allocation5], %s263_s19  ;;  %s1361_s12 = scalar_lea.hbm %s1627_s24, 128 }
  0x3c   : > { %p1362_p13 = scmp.ne.s32.totalorder %s1627_s24, %s1361_s12  ;;  %p1363_p0 = pneg %p1629_p11 }
  0x3d   : > { %s1366_s22 = scalar_lea.hbm %s1808_s1, 256  ;;  %p1367_p1 = scmp.lt.s32.totalorder %s1627_s24, %s1808_s1 }
  0x3e   : > { %p1364_p5 = pnand %p1363_p0, %p1362_p13  ;;  %p1368_p2 = scmp.lt.s32.totalorder %s1366_s22, %s1361_s12 }
  0x40   : > { %p1365_p10 = pneg %p1364_p5  ;;  %p1369_p6 = por %p1368_p2, %p1367_p1 }
  0x42   : > { %p1370_p12 = pnand %p1369_p6, %p1365_p10 }
  0x44   : > { %1373 = shalt.err (!%p1370_p12)
}
  0x45   : > { %s1374_s25 = scalar_lea.vmem %s275_s26, 128  ;;  %s1466_s19 = smov [#allocation4]  }
  0x46   : > { %p1375_p7 = scmp.ne.s32.totalorder %s275_s26, %s1374_s25  ;;  %s1379_s2 = sshll.u32 %s1466_s19, 4  ;;  %s1380_s2 = int_to_ptr.vmem [resolvable:$false] %s1379_s2 }
  0x47   : > { %s1381_s4 = scalar_lea.vmem %s1380_s2, 256  ;;  %p1382_p13 = scmp.lt.s32.totalorder %s275_s26, %s1380_s2 }
  0x48   : > { %p1377_p9 = pnand %p1375_p7, %p1363_p0  ;;  %p1383_p5 = scmp.lt.s32.totalorder %s1381_s4, %s1374_s25 }
  0x4a   : > { %p1378_p3 = pneg %p1377_p9  ;;  %p1384_p4 = por %p1383_p5, %p1382_p13 }
  0x4c   : > { %p1385_p8 = pnand %p1384_p4, %p1378_p3 }
  0x4e   : > { %1388 = shalt.err (!%p1385_p8)
}
  0x4f   : > { %1215 = dma.hbm_to_vmem [thread:$0]  (!%p1629_p11), %s1627_s24, 128, %s275_s26, %s264_s28  }
  0x50   : > { %p1831_p10 = scmp.ne.s32.totalorder %s1824_s15, 0 }
  0x51   : > { %s1650_s12 = sand.u32 (!%p1831_p10), 1, %s1451_s9   ;;  %p1832_p4 = scmp.ne.s32.totalorder (!%p1831_p10), %s1822_s13, 0 }
  0x52   : > { %283 = sbr.rel (%p1831_p10) target bundleno = 1658 (0x67a), region = 48  ;;  %s1081_s16 = sshll.u32 (!%p1831_p10), %s1650_s12, 3 }
  0x53   : > { %s286_s2 = scalar_lea.sflag (!%p1831_p10), [#allocation5], %s1650_s12  ;;  %s289_s4 = scalar_lea.vmem (!%p1831_p10), [#allocation4], %s1081_s16 }
  0x57   : > { %1434 = dma.done.wait (%p1832_p4), %s286_s2, 128  }
  0x58   : > { %1436 = vsyncadd (%p1832_p4), %s286_s2, 4294967168  ;;  %p1833_p8 = scmp.eq.s32.totalorder %s1553_s0, 0 }
  0x5a   : > { %1438 = dma.done.wait (%p1833_p8), [#allocation8], 512   ;;  %p1834_p3 = pmov %p1833_p8 }
  0x5b   : > { %v1467_v0 = vmov 0.0   ;;  %vm1468_vm0 = vmmov 0   ;;  %v1279_v1 = vld [vmem:[#allocation7 + $0x8] sm:$0xff]   ;;  %v1280_v2 = vld [vmem:[#allocation7] sm:$0xff]   ;;  %v1670_v3 = vld [vmem:[%s289_s4] sm:$0xff]  ;;  %vm354_vm1 = vcmask 261120   ;;  %v398_v23 = vlaneseq }
  0x5c   : > { %1440 = vsyncadd (%p1834_p3), [#allocation8], 4294966784  ;;  %1129 = vmatprep.subr.bf16.mxu0 %v1467_v0  ;;  %1133 = vmatprep.mubr.msk.bf16.mxu0 %vm1468_vm0, %v1467_v0  ;;  %v330_v4 = vpack.c.bf16 %v1670_v3, %v1670_v3  ;;  %v1085_v5 = vld [vmem:[%s1810_s3] ss:$0 sm:$0xff]  ;;  %s1469_s24 = smov 120   ;;  %s1470_s26 = smov 96  }
  0x5d   : > { %1137 = vmatprep.subr.bf16.mxu1 %v1467_v0  ;;  %1139 = vmatprep.mubr.msk.bf16.mxu1 %vm1468_vm0, %v1467_v0  ;;  %s1471_s27 = smov 80   ;;  %s1472_s28 = smov 88   ;;  %vm407_vm2 = vcmask 64512   ;;  %v399_v24 = vand.u32 127, %v398_v23  ;;  %vm472_vm4 = vcmask 1043456   ;;  %vm867_vm5 = vcmask 130048  }
  0x5e   : > { %1130 = vmatpush3.bf16.msra.mxu0 %v1279_v1  ;;  %s1473_s20 = smov 72   ;;  %s1474_s22 = smov 112   ;;  %vm870_vm6 = vcmask 195584  }
  0x5f   : > { %1131 = vmatprep.subr.bf16.mxu0 %v1467_v0  ;;  %s1475_s23 = smov 104   ;;  %s400_s21 = sld [smem:[#allocation3 + %s1553_s0]] }
  0x60   : > { %s1476_s25 = smov 56   ;;  %s1477_s19 = smov 64  }
  0x61   : > { %s1478_s2 = smov 40   ;;  %s1479_s4 = smov 48  }
  0x62   : > { %1132 = vmatpush3.bf16.msra.mxu0 %v1280_v2  ;;  %s1480_s13 = smov 8   ;;  %s1481_s15 = smov 16  }
  0x63   : > { %1143 = vmatprep.subr.bf16.mxu0 %v1467_v0  ;;  %p1837_p0 = scmp.ne.s32.totalorder %s1829_s17, 0 }
  0x65   : > { %1134 = vmatmul.mubr.msk.bf16.vlgmr.msra.gmra.mxu0 %vm354_vm1, %v330_v4  ;;  %v401_v25 = vstv %s400_s21  ;;  %s1104_s21 = sshll.u32 %s1553_s0, 7 }
  0x66   : > { %1145 = vmatprep.mubr.msk.bf16.mxu0 %vm1468_vm0, %v1467_v0  ;;  %vm1713_vm3 = vcmp.lt.s32.totalorder %v399_v24, %v401_v25 }
 0x125   : > { %v392_v6 = vpop.f32.mrf.mxu0 }
 0x126   : > { %v393_v7 = vadd.f32 %v1085_v5, %v392_v6 }
 0x127   : > { %v1135_v8 = vpop.f32.mrf.mxu0 }
 0x128   : > { %v1682_v9 = vpack.c.bf16 %v393_v7, %v393_v7 }
 0x129   : > { %v395_v10 = vpop.f32.mrf.mxu0 }
 0x12a   : > { %519 = vrot.lane.b32.xlu1 %v1682_v9, %s1469_s24  ;;  %405 = vrot.lane.b32.xlu0 %v1682_v9, %s1470_s26  ;;  %s1482_s24 = smov 24   ;;  %s1483_s26 = smov [#allocation10]  }
 0x12b   : > { %v1136_v11 = vpop.f32.mrf.mxu0  ;;  %s1393_s0 = sshll.u32 %s1483_s26, 4  ;;  %s1394_s0 = int_to_ptr.vmem [resolvable:$false] %s1393_s0 }
 0x12e   : > { %633 = vrot.lane.b32.xlu1 %v1682_v9, %s1471_s27  ;;  %521 = vrot.lane.b32.xlu0 %v1682_v9, %s1472_s28 }
 0x132   : > { %745 = vrot.lane.b32.xlu1 %v1682_v9, %s1473_s20  ;;  %631 = vrot.lane.b32.xlu0 %v1682_v9, %s1474_s22 }
 0x136   : > { %743 = vrot.lane.b32.xlu0 %v1682_v9, %s1475_s23 }
 0x19c   : > { %v406_v12 = vpop.permute.xlu0 %405  ;;  %v520_v15 = vpop.permute.xlu1 %519 }
 0x19d   : > { %v412_v13 = vsel %vm407_vm2, %v406_v12, 0 }
 0x19e   : > { %1138 = vmatpush3.bf16.xpose.msra.mxu1 %v412_v13 }
 0x19f   : > { %1149 = vmatprep.subr.bf16.mxu1 %v1467_v0 }
 0x1a0   : > { %v522_v14 = vpop.permute.xlu0 %521  ;;  %v634_v17 = vpop.permute.xlu1 %633 }
 0x1a1   : > { %v527_v16 = vsel %vm407_vm2, %v522_v14, 0  ;;  %v639_v18 = vsel %vm407_vm2, %v634_v17, 0 }
 0x1a4   : > { %v746_v19 = vpop.permute.xlu1 %745  ;;  %v632_v20 = vpop.permute.xlu0 %631 }
 0x1a5   : > { %1140 = vmatmul.mubr.msk.bf16.vlgmr.msra.gmra.mxu1 %vm407_vm2, %v1682_v9  ;;  %v751_v21 = vsel %vm407_vm2, %v746_v19, 0 }
 0x1a6   : > { %1150 = vmatpush3.bf16.xpose.msra.mxu1 %v527_v16  ;;  %1151 = vmatprep.mubr.msk.bf16.mxu1 %vm1468_vm0, %v1467_v0 }
 0x1a7   : > { %1161 = vmatprep.subr.bf16.mxu1 %v1467_v0 }
 0x1a8   : > { %v744_v22 = vpop.permute.xlu0 %743 }
 0x1ad   : > { %1152 = vmatmul.mubr.msk.bf16.vlgmr.msra.gmra.mxu1 %vm407_vm2, %v520_v15 }
 0x1ae   : > { %1162 = vmatpush3.bf16.xpose.msra.mxu1 %v639_v18  ;;  %1163 = vmatprep.mubr.msk.bf16.mxu1 %vm1468_vm0, %v1467_v0 }
 0x1af   : > { %1173 = vmatprep.subr.bf16.mxu1 %v1467_v0 }
 0x1b5   : > { %1164 = vmatmul.mubr.msk.bf16.vlgmr.msra.gmra.mxu1 %vm407_vm2, %v632_v20 }
 0x1b6   : > { %1174 = vmatpush3.bf16.xpose.msra.mxu1 %v751_v21  ;;  %1175 = vmatprep.mubr.msk.bf16.mxu1 %vm1468_vm0, %v1467_v0 }
 0x1b7   : > { %1185 = vmatprep.subr.bf16.mxu1 %v1467_v0 }
 0x1bd   : > { %1176 = vmatmul.mubr.msk.bf16.vlgmr.msra.gmra.mxu1 %vm407_vm2, %v744_v22 }
 0x1be   : > { %1189 = vmatprep.mubr.msk.bf16.mxu1 %vm1468_vm0, %v1467_v0 }
 0x265   : > { %v448_v27 = vpop.f32.mrf.mxu1 }
 0x266   : > { %v456_v28 = vsel %vm1713_vm3, %v448_v27, -2.1474836e+09 }
 0x267   : > { %v1141_v29 = vpop.f32.mrf.mxu1  ;;  %v457_v30 = vsel %vm407_vm2, %v456_v28, -inf }
 0x268   : > { %458 = vmax.xlane.f32.xlu1 %v457_v30 }
 0x269   : > { %v451_v31 = vpop.f32.mrf.mxu1 }
 0x26b   : > { %v1142_v32 = vpop.f32.mrf.mxu1 }
 0x26d   : > { %v563_v33 = vpop.f32.mrf.mxu1 }
 0x26e   : > { %v569_v34 = vsel %vm1713_vm3, %v563_v33, -2.1474836e+09 }
 0x26f   : > { %v1153_v35 = vpop.f32.mrf.mxu1  ;;  %v570_v36 = vsel %vm407_vm2, %v569_v34, -inf }
 0x270   : > { %571 = vmax.xlane.f32.xlu0 %v570_v36  ;;  %v1282_v35 = vld [vmem:[#allocation9] sm:$0xff]  }
 0x271   : > { %v566_v37 = vpop.f32.mrf.mxu1 }
 0x273   : > { %v1154_v38 = vpop.f32.mrf.mxu1 }
 0x275   : > { %v675_v39 = vpop.f32.mrf.mxu1 }
 0x276   : > { %v681_v40 = vsel %vm1713_vm3, %v675_v39, -2.1474836e+09 }
 0x277   : > { %v1165_v41 = vpop.f32.mrf.mxu1  ;;  %v682_v42 = vsel %vm407_vm2, %v681_v40, -inf }
 0x278   : > { %683 = vmax.xlane.f32.xlu0 %v682_v42 }
 0x279   : > { %580 = vrot.lane.b32.xlu1 %v1682_v9, %s1476_s25  ;;  %v678_v43 = vpop.f32.mrf.mxu1  ;;  %s327_s25 = scalar_lea.vmem [#allocation10], %s1081_s16  ;;  %s1395_s16 = scalar_lea.vmem %s1394_s0, 256 }
 0x27b   : > { %v1166_v44 = vpop.f32.mrf.mxu1 }
 0x27d   : > { %v787_v45 = vpop.f32.mrf.mxu1 }
 0x27e   : > { %v793_v49 = vsel %vm1713_vm3, %v787_v45, -2.1474836e+09 }
 0x27f   : > { %v1177_v46 = vpop.f32.mrf.mxu1  ;;  %v794_v50 = vsel %vm407_vm2, %v793_v49, -inf }
 0x281   : > { %v790_v47 = vpop.f32.mrf.mxu1 }
 0x283   : > { %v1178_v48 = vpop.f32.mrf.mxu1 }
 0x28e   : > { %467 = vrot.lane.b32.xlu0 %v1682_v9, %s1477_s19  ;;  %s984_s19 = sshll.u32 %s327_s25, 4  ;;  %s985_s19 = int_to_ptr.vmem [resolvable:$true] %s984_s19 }
 0x28f   : > { %p1396_p6 = scmp.lt.s32.totalorder %s985_s19, %s1394_s0 }
 0x292   : > { %804 = vrot.lane.b32.xlu0 %v1682_v9, %s1478_s2 }
 0x29d   : > { %795 = vmax.xlane.f32.xlu1 %v794_v50 }
 0x2ae   : > { %692 = vrot.lane.b32.xlu1 %v1682_v9, %s1479_s4 }
 0x2f1   : > { %v459_v51 = vpop.xlane.xlu1 %458 }
 0x2f2   : > { %v460_v52 = vsub.f32 %v456_v28, %v459_v51 }
 0x2f4   : > { %v461_v53 = vmul.f32 1.442695, %v460_v52 }
 0x2f5   : > { %v581_v63 = vpop.permute.xlu1 %580 }
 0x2f6   : > { %1283 = vpow2.f32 %v461_v53  ;;  %v586_v2 = vsel %vm472_vm4, %v581_v63, 0 }
 0x2f9   : > { %v572_v54 = vpop.xlane.xlu0 %571 }
 0x2fa   : > { %v573_v55 = vsub.f32 %v569_v34, %v572_v54  ;;  %v1281_v34 = vld [vmem:[#allocation9 + $0x8] sm:$0xff]  }
 0x2fb   : > { %1186 = vmatpush3.bf16.msra.mxu1 %v1281_v34 }
 0x2fc   : > { %v574_v56 = vmul.f32 1.442695, %v573_v55  ;;  %1187 = vmatprep.subr.bf16.mxu1 %v1467_v0 }
 0x2fe   : > { %1285 = vpow2.f32 %v574_v56 }
 0x2ff   : > { %1188 = vmatpush3.bf16.msra.mxu1 %v1282_v35 }
 0x301   : > { %v684_v57 = vpop.xlane.xlu0 %683 }
 0x302   : > { %v685_v58 = vsub.f32 %v681_v40, %v684_v57 }
 0x303   : > { %v1284_v60 = vpop.eup %1283 }
 0x304   : > { %v686_v59 = vmul.f32 1.442695, %v685_v58  ;;  %v466_v1 = vpack.c.bf16 %v1284_v60, %v1284_v60  ;;  %v463_v6 = vsel %vm407_vm2, %v1284_v60, 0.0  ;;  %v1097_v60 = vld [vmem:[%s1812_s5] ss:$0 sm:$0xff] }
 0x305   : > { %v468_v61 = vpop.permute.xlu0 %467 }
 0x306   : > { %1287 = vpow2.f32 %v686_v59  ;;  %v474_v62 = vsel %vm472_vm4, %v468_v61, 0 }
 0x307   : > { %1144 = vmatpush3.bf16.msra.mxu0 %v474_v62 }
 0x308   : > { %1155 = vmatprep.subr.bf16.mxu0 %v1467_v0 }
 0x309   : > { %v805_v15 = vpop.permute.xlu0 %804 }
 0x30a   : > { %1146 = vmatmul.mubr.msk.bf16.vlgmr.msra.gmra.mxu0 %vm407_vm2, %v466_v1  ;;  %v810_v17 = vsel %vm472_vm4, %v805_v15, 0 }
 0x30b   : > { %v1286_v4 = vpop.eup %1285  ;;  %1156 = vmatpush3.bf16.msra.mxu0 %v586_v2  ;;  %1157 = vmatprep.mubr.msk.bf16.mxu0 %vm1468_vm0, %v1467_v0 }
 0x30c   : > { %v576_v5 = vsel %vm407_vm2, %v1286_v4, 0.0  ;;  %1167 = vmatprep.subr.bf16.mxu0 %v1467_v0  ;;  %v579_v7 = vpack.c.bf16 %v1286_v4, %v1286_v4 }
 0x30d   : > { %577 = vadd.xlane.f32.xlu1 %v576_v5 }
 0x311   : > { %464 = vadd.xlane.f32.xlu1 %v463_v6 }
 0x312   : > { %1158 = vmatmul.mubr.msk.bf16.vlgmr.msra.gmra.mxu0 %vm407_vm2, %v579_v7 }
 0x313   : > { %v1288_v8 = vpop.eup %1287  ;;  %1169 = vmatprep.mubr.msk.bf16.mxu0 %vm1468_vm0, %v1467_v0 }
 0x314   : > { %v688_v9 = vsel %vm407_vm2, %v1288_v8, 0.0  ;;  %v691_v16 = vpack.c.bf16 %v1288_v8, %v1288_v8 }
 0x315   : > { %689 = vadd.xlane.f32.xlu0 %v688_v9 }
 0x326   : > { %v796_v10 = vpop.xlane.xlu1 %795 }
 0x327   : > { %v797_v11 = vsub.f32 %v793_v49, %v796_v10 }
 0x329   : > { %v798_v12 = vmul.f32 1.442695, %v797_v11 }
 0x32a   : > { %v693_v13 = vpop.permute.xlu1 %692 }
 0x32b   : > { %1289 = vpow2.f32 %v798_v12  ;;  %v698_v14 = vsel %vm472_vm4, %v693_v13, 0 }
 0x32c   : > { %1168 = vmatpush3.bf16.msra.mxu0 %v698_v14  ;;  %v1101_v14 = vld [vmem:[%s1813_s6] ss:$0 sm:$0xff] }
 0x32d   : > { %1179 = vmatprep.subr.bf16.mxu0 %v1467_v0 }
 0x32f   : > { %1170 = vmatmul.mubr.msk.bf16.vlgmr.msra.gmra.mxu0 %vm407_vm2, %v691_v16  ;;  %v1102_v16 = vld [vmem:[%s1814_s7] ss:$0 sm:$0xff] }
 0x330   : > { %1180 = vmatpush3.bf16.msra.mxu0 %v810_v17  ;;  %1181 = vmatprep.mubr.msk.bf16.mxu0 %vm1468_vm0, %v1467_v0 }
 0x338   : > { %v1290_v18 = vpop.eup %1289 }
 0x339   : > { %v800_v19 = vsel %vm407_vm2, %v1290_v18, 0.0  ;;  %v803_v20 = vpack.c.bf16 %v1290_v18, %v1290_v18 }
 0x33a   : > { %801 = vadd.xlane.f32.xlu0 %v800_v19 }
 0x33b   : > { %1182 = vmatmul.mubr.msk.bf16.vlgmr.msra.gmra.mxu0 %vm407_vm2, %v803_v20 }
 0x396   : > { %v578_v21 = vpop.xlane.xlu1 %577 }
 0x397   : > { %1291 = vrcp.f32 %v578_v21 }
 0x39a   : > { %v465_v50 = vpop.xlane.xlu1 %464 }
 0x39e   : > { %v690_v33 = vpop.xlane.xlu0 %689 }
 0x39f   : > { %1293 = vrcp.f32 %v690_v33 }
 0x3a4   : > { %v1292_v26 = vpop.eup %1291 }
 0x3ac   : > { %v1294_v37 = vpop.eup %1293 }
 0x3c3   : > { %v802_v36 = vpop.xlane.xlu0 %801 }
 0x3c4   : > { %1295 = vrcp.f32 %v802_v36 }
 0x3c5   : > { %1297 = vrcp.f32 %v465_v50 }
 0x3ca   : > { %v510_v22 = vpop.f32.mrf.mxu0 }
 0x3cc   : > { %v1147_v23 = vpop.f32.mrf.mxu0 }
 0x3ce   : > { %v513_v24 = vpop.f32.mrf.mxu0 }
 0x3d0   : > { %v1148_v25 = vpop.f32.mrf.mxu0 }
 0x3d1   : > { %v1296_v44 = vpop.eup %1295 }
 0x3d2   : > { %v622_v27 = vpop.f32.mrf.mxu0  ;;  %v1298_v51 = vpop.eup %1297 }
 0x3d3   : > { %v629_v28 = vmul.f32 %v1292_v26, %v622_v27  ;;  %v517_v52 = vmul.f32 %v1298_v51, %v510_v22 }
 0x3d4   : > { %v1159_v29 = vpop.f32.mrf.mxu0 }
 0x3d5   : > { %v630_v30 = vpack.c.bf16 %v629_v28, %v629_v28  ;;  %v518_v55 = vpack.c.bf16 %v517_v52, %v517_v52 }
 0x3d6   : > { %v625_v31 = vpop.f32.mrf.mxu0 }
 0x3d7   : > { %856 = vrot.lane.b32.xlu0 %v630_v30, %s1480_s13  ;;  %s982_s13 = scalar_lea.hbm %s1815_s8, %s1104_s21 }
 0x3d8   : > { %v1160_v32 = vpop.f32.mrf.mxu0 }
 0x3ef   : > { %v734_v38 = vpop.f32.mrf.mxu0 }
 0x3f0   : > { %v741_v39 = vmul.f32 %v1294_v37, %v734_v38 }
 0x3f1   : > { %v1171_v40 = vpop.f32.mrf.mxu0 }
 0x3f2   : > { %v742_v41 = vpack.c.bf16 %v741_v39, %v741_v39 }
 0x3f3   : > { %v737_v42 = vpop.f32.mrf.mxu0 }
 0x3f4   : > { %859 = vrot.lane.b32.xlu1 %v742_v41, %s1481_s15  ;;  %s971_s15 = scalar_lea.sflag [#allocation6], %s1650_s12 }
 0x3f5   : > { %v1172_v43 = vpop.f32.mrf.mxu0 }
 0x3fb   : > { %v846_v45 = vpop.f32.mrf.mxu0 }
 0x3fc   : > { %v853_v46 = vmul.f32 %v1296_v44, %v846_v45 }
 0x3fd   : > { %v1183_v47 = vpop.f32.mrf.mxu0 }
 0x3fe   : > { %v854_v48 = vpack.c.bf16 %v853_v46, %v853_v46 }
 0x3ff   : > { %v849_v49 = vpop.f32.mrf.mxu0 }
 0x400   : > { %862 = vrot.lane.b32.xlu1 %v854_v48, %s1482_s24  ;;  %s1389_s24 = scalar_lea.vmem %s985_s19, 128 }
 0x401   : > { %v1184_v0 = vpop.f32.mrf.mxu0  ;;  %p1390_p11 = scmp.ne.s32.totalorder %s985_s19, %s1389_s24  ;;  %p1397_p12 = scmp.lt.s32.totalorder %s1395_s16, %s1389_s24 }
 0x403   : > { %p1391_p1 = pnand %p1390_p11, %p1837_p0  ;;  %p1398_p7 = por %p1397_p12, %p1396_p6 }
 0x405   : > { %p1392_p2 = pneg %p1391_p1 }
 0x407   : > { %p1399_p9 = pnand %p1398_p7, %p1392_p2 }
 0x449   : > { %v857_v53 = vpop.permute.xlu0 %856 }
 0x44a   : > { %v866_v56 = vsel %vm407_vm2, %v518_v55, %v857_v53 }
 0x466   : > { %v860_v54 = vpop.permute.xlu1 %859 }
 0x467   : > { %v869_v57 = vsel %vm867_vm5, %v866_v56, %v860_v54 }
 0x472   : > { %v863_v58 = vpop.permute.xlu1 %862 }
 0x473   : > { %v872_v59 = vsel %vm870_vm6, %v869_v57, %v863_v58 }
 0x474   : > { %1190 = vmatmul.mubr.msk.bf16.vlgmr.msra.gmra.mxu1 %vm354_vm1, %v872_v59 }
 0x534   : > { %v932_v61 = vpop.f32.mrf.mxu1 }
 0x535   : > { %v933_v62 = vadd.f32 %v1097_v60, %v932_v61 }
 0x536   : > { %v1191_v63 = vpop.f32.mrf.mxu1 }
 0x537   : > { %v938_v1 = vadd.f32 %v933_v62, %v1670_v3 }
 0x538   : > { %v935_v2 = vpop.f32.mrf.mxu1 }
 0x539   : > { %v939_v4 = vsel %vm354_vm1, %v938_v1, 0.0 }
 0x53a   : > { %940 = vadd.xlane.f32.xlu0 %v939_v4  ;;  %v1192_v5 = vpop.f32.mrf.mxu1 }
 0x5c3   : > { %v941_v6 = vpop.xlane.xlu0 %940 }
 0x5c4   : > { %v943_v7 = vmul.f32 0.03125, %v941_v6 }
 0x5c6   : > { %v944_v8 = vsub.f32 %v938_v1, %v943_v7 }
 0x5c8   : > { %v945_v9 = vmul.f32 %v944_v8, %v944_v8 }
 0x5ca   : > { %v946_v10 = vsel %vm354_vm1, %v945_v9, 0.0 }
 0x5cb   : > { %947 = vadd.xlane.f32.xlu1 %v946_v10 }
 0x654   : > { %v948_v11 = vpop.xlane.xlu1 %947 }
 0x655   : > { %v949_v12 = vmul.f32 0.03125, %v948_v11 }
 0x657   : > { %v950_v13 = vadd.f32 1e-12, %v949_v12 }
 0x659   : > { %1299 = vrsqrt.f32 %v950_v13 }
 0x666   : > { %v1300_v3 = vpop.eup %1299 }
 0x667   : > { %v952_v15 = vmul.f32 %v1300_v3, %v944_v8 }
 0x669   : > { %v960_v17 = vmul.f32 %v1101_v14, %v952_v15 }
 0x66b   : > { %v968_v18 = vadd.f32 %v1102_v16, %v960_v17 }
 0x66d   : > { %969 = vst.msk [vmem:[%s327_s25] sm:$0xff] %vm354_vm1, %v968_v18 }
 0x66e   : > { %1402 = shalt.err (!%p1399_p9)
}
 0x66f   : > { %s1403_s27 = scalar_lea.hbm %s982_s13, 128  ;;  %s1407_s20 = scalar_lea.hbm %s1815_s8, 256 }
 0x670   : > { %p1404_p13 = scmp.ne.s32.totalorder %s982_s13, %s1403_s27  ;;  %p1408_p4 = scmp.lt.s32.totalorder %s982_s13, %s1815_s8 }
 0x671   : > { %p1409_p8 = scmp.lt.s32.totalorder %s1407_s20, %s1403_s27 }
 0x672   : > { %p1405_p5 = pnand %p1404_p13, %p1837_p0 }
 0x673   : > { %p1410_p3 = por %p1409_p8, %p1408_p4 }
 0x674   : > { %p1406_p10 = pneg %p1405_p5 }
 0x676   : > { %p1411_p11 = pnand %p1410_p3, %p1406_p10 }
 0x678   : > { %1414 = shalt.err (!%p1411_p11)
}
 0x679   : > { %1203 = dma.vmem_to_hbm [thread:$0]  (%p1837_p0), %s985_s19, 128, %s982_s13, %s971_s15  }
 0x67a PF: > { %s996_s21 = sand.u32 1, %s1447_s30   ;;  %p1838_p1 = scmp.ne.s32.totalorder %s1823_s14, 0 }
 0x67b   : > { %p1839_p2 = scmp.ge.s32.totalorder %s1459_s11, 2  ;;  %s997_s25 = scalar_lea.sflag [#allocation6], %s996_s21 }
 0x67d   : > { %p1217_p6 = pnand %p1839_p2, %p1838_p1 }
 0x67f   : > { %p1218_p12 = pneg %p1217_p6 }
 0x681   : > { %1442 = dma.done.wait (%p1218_p12), %s997_s25, 128  }
 0x682   : > { %1444 = vsyncadd (%p1218_p12), %s997_s25, 4294967168  ;;  %p26_p7 = scmp.ge.s32.totalorder %s1604_s29, 4   ;;  %s1840_s30 = smov %s1451_s9 }
 0x683   : > { %s1841_s9 = smov %s1455_s10  ;;  %s1842_s10 = smov %s1620_s18 }
 0x684   : > { %s1843_s11 = smov %s1604_s29  ;;  %28 = sbr.rel (!%p26_p7) target bundleno = 13 (0xd), region = 101 }
 0x689   :  { %1002 = vsyncpa [#allocation5], 1 }
 0x68a   :  { %1004 = vsyncpa [#allocation5 + $0x1], 1 }
 0x68b   :  { %1005 = vsyncpa [#allocation8], 1 }
 0x68c   :  { %1006 = vsyncpa [#allocation6], 1 }
 0x68d   :  { %1008 = vsyncpa [#allocation6 + $0x1], 1 }

</bundles_post_ra>
